<compile_context>
chip_gen: v5e
topology: v5e:2x2
jax: 0.10.0
libtpu: 0.0.40
codegen_flags: <defaults>
</compile_context>

<pallas_src>
import functools

import jax
import jax.numpy as jnp
from jax.experimental import pallas as pl
from jax.experimental.pallas import tpu as pltpu


_SMALL_DIM = 8  # layers with a dimension <= this skip the MXU


def _round_up(x, m):
    return ((x + m - 1) // m) * m


def _layer_modes(layer_dims):
    """Static per-layer compute mode chosen from the layer widths."""
    modes = []
    for l in range(len(layer_dims) - 1):
        fan_in, fan_out = layer_dims[l], layer_dims[l + 1]
        if fan_in <= _SMALL_DIM:
            modes.append("bcast_fma")   # VPU outer-product broadcast FMA
        elif fan_out <= _SMALL_DIM:
            modes.append("reduce")      # VPU multiply + grouped XLU sublane reduce
        else:
            modes.append("mxu")         # regular MXU matmul
    return tuple(modes)


def _make_mlp_kernel(modes, tanh_bf16):
    """Builds the MLP kernel; compute happens in (features, block_m) layout."""
    num_layers = len(modes)

    def kernel(x_ref, *refs):
        # refs = (w0, b0, w1, b1, ..., w_{L-1}, b_{L-1}, out_ref)
        out_ref = refs[-1]
        param_refs = refs[:-1]

        # (block_m, in_dim) -> (in_dim, block_m): batch goes to lanes.  Tiny XLU
        # transpose; the XLU slot is idle in this kernel so this is effectively free.
        h = x_ref[...].astype(jnp.float32).T

        for l, mode in enumerate(modes):
            w = param_refs[2 * l][...].astype(jnp.float32)
            b = param_refs[2 * l + 1][...].astype(jnp.float32)  # (out_l, 1)

            if mode == "bcast_fma":
                # w: (out_l, in_l) with tiny in_l; h: (in_l, block_m).
                # W @ h as a sum of broadcast FMAs on the VPU (no MXU padding).
                in_l = w.shape[1]
                z = w[:, 0:1] * h[0:1, :]
                for k in range(1, in_l):
                    z = z + w[:, k : k + 1] * h[k : k + 1, :]
                h = z + b
            elif mode == "reduce":
                # w passed pre-transposed as (in_l, out_l) with tiny out_l.
                in_l, out_l = w.shape
                rows = []
                for j in range(out_l):
                    z = w[:, j : j + 1] * h                      # (in_l, block_m) VPU
                    if in_l > 8 and in_l % 8 == 0:
                        # VPU-add the 8-sublane groups, then one 8-wide XLU reduce
                        # (far less vex-slot work than a full in_l-deep reduce).
                        t = z[0:8]
                        for g in range(8, in_l, 8):
                            t = t + z[g : g + 8]
                    else:
                        t = z
                    rows.append(
                        jnp.sum(t, axis=0, keepdims=True) + b[j : j + 1, :]
                    )
                h = jnp.concatenate(rows, axis=0) if out_l > 1 else rows[0]
            else:
                # MXU path: (out_l, in_l) @ (in_l, block_m) -> (out_l, block_m).
                h = jnp.dot(w, h, preferred_element_type=jnp.float32) + b

            if l < num_layers - 1:
                if tanh_bf16:
                    # v6e/v7x only (bf16 EUP); do NOT enable on v5e.
                    h = jnp.tanh(h.astype(jnp.bfloat16)).astype(jnp.float32)
                else:
                    h = jnp.tanh(h)

        # (out_dim, block_m) -> (block_m, out_dim); ragged tail rows (if any) are
        # discarded by Pallas on writeback.
        out_ref[...] = h.T.astype(out_ref.dtype)

    return kernel


def init_dnn_params(key, layers, dtype=jnp.float32):
    """Deterministic init mimicking torch.nn.Linear default (U(-1/sqrt(fan_in), +))."""
    params = []
    for i in range(len(layers) - 1):
        fan_in, fan_out = layers[i], layers[i + 1]
        key, kw, kb = jax.random.split(key, 3)
        bound = 1.0 / jnp.sqrt(float(fan_in))
        # PyTorch stores W as (out, in); keep that convention here.
        w = jax.random.uniform(kw, (fan_out, fan_in), dtype, -bound, bound)
        b = jax.random.uniform(kb, (fan_out,), dtype, -bound, bound)
        params.append((w, b))
    return params


@functools.partial(jax.jit, static_argnames=("block_m", "tanh_bf16"))
def dnn_forward(x, params, *, block_m=1024, tanh_bf16=False):
    """Pallas forward pass of the DNN.  x: (N, layers[0]).  Returns (N, layers[-1])."""
    n, in_dim = x.shape
    num_layers = len(params)
    layer_dims = [in_dim] + [w.shape[0] for (w, _) in params]
    out_dim = layer_dims[-1]
    modes = _layer_modes(layer_dims)

    if n <= block_m:
        # Small-N fast path: one ragged tile, single grid step.
        block_m = max(8, _round_up(n, 8))
    else:
        grid_steps = pl.cdiv(n, block_m)
        if grid_steps % 2 == 1:
            # Even step count so v7x's two TensorCores split the grid evenly.
            grid_steps += 1
            block_m = max(8, _round_up(pl.cdiv(n, grid_steps), 8))
    grid_steps = pl.cdiv(n, block_m)

    # Orient parameters for the kernel (glue, plain JAX) and build constant-index
    # specs: the param blocks are fetched once and held in VMEM across the grid.
    flat_params = []
    param_specs = []
    for (w, b), mode in zip(params, modes):
        wk = w.T if mode == "reduce" else w     # reduce path wants (in, out)
        bk = b.reshape(-1, 1)                   # (out, 1): broadcasts over lanes
        flat_params += [wk, bk]
        param_specs += [
            pl.BlockSpec(wk.shape, lambda i: (0, 0)),
            pl.BlockSpec(bk.shape, lambda i: (0, 0)),
        ]

    n_eff = grid_steps * block_m
    flops = 2 * n_eff * sum(layer_dims[l] * layer_dims[l + 1] for l in range(num_layers))
    transcendentals = n_eff * sum(layer_dims[1:-1])
    bytes_accessed = 4 * n * (in_dim + out_dim) + 4 * sum(
        layer_dims[l] * layer_dims[l + 1] + layer_dims[l + 1] for l in range(num_layers)
    )

    kernel = _make_mlp_kernel(modes, tanh_bf16)

    return pl.pallas_call(
        kernel,
        out_shape=jax.ShapeDtypeStruct((n, out_dim), x.dtype),
        grid_spec=pltpu.PrefetchScalarGridSpec(
            num_scalar_prefetch=0,
            grid=(grid_steps,),
            in_specs=[pl.BlockSpec((block_m, in_dim), lambda i: (i, 0))] + param_specs,
            out_specs=pl.BlockSpec((block_m, out_dim), lambda i: (i, 0)),
        ),
        compiler_params=pltpu.CompilerParams(
            dimension_semantics=("parallel",),
        ),
        cost_estimate=pl.CostEstimate(
            flops=flops,
            transcendentals=transcendentals,
            bytes_accessed=bytes_accessed,
        ),
    )(x, *flat_params)


def dnn_forward_ref(x, params):
    """Pure-JAX reference matching PyTorch semantics."""
    h = x.astype(jnp.float32)
    for i, (w, b) in enumerate(params):
        h = h @ w.T + b
        if i < len(params) - 1:
            h = jnp.tanh(h)
    return h.astype(x.dtype)


if __name__ == "__main__":
    # Typical PINN config: 2 spatial inputs -> 3 hidden layers of 32 -> 2 displacements.
    layers = [2, 32, 32, 32, 2]

    key = jax.random.PRNGKey(0)
    key, kp, kx, kx2 = jax.random.split(key, 4)
    params = init_dnn_params(kp, layers, dtype=jnp.float32)

    batch = 1000  # deliberately NOT a multiple of block_m -> exercises the ragged tail
    x = jax.random.normal(kx, (batch, layers[0]), dtype=jnp.float32)
    ref = dnn_forward_ref(x, params)

    # Multi-step grid with a ragged last block (1000 = 3*256 + 232).
    out_multi = jax.block_until_ready(dnn_forward(x, params, block_m=256))
    assert out_multi.shape == (batch, layers[-1]), out_multi.shape
    assert jnp.allclose(out_multi, ref, atol=1e-5, rtol=1e-4), "multi-step mismatch"

    # Small-N fast path: single ragged tile (default block_m >= batch).
    out_single = jax.block_until_ready(dnn_forward(x, params))
    assert jnp.allclose(out_single, ref, atol=1e-5, rtol=1e-4), "single-tile mismatch"

    # Tiny, non-multiple-of-8 batch: round-up-to-8 single tile.
    x_small = jax.random.normal(kx2, (37, layers[0]), dtype=jnp.float32)
    out_small = jax.block_until_ready(dnn_forward(x_small, params))
    assert jnp.allclose(out_small, dnn_forward_ref(x_small, params),
                        atol=1e-5, rtol=1e-4), "small-batch mismatch"

    print("KERNEL_OK")
</pallas_src>

<mosaic_0001>
module attributes {stable_mosaic.version = 11 : i64} {
  func.func @kernel(%arg0: i32, %arg1: memref<256x2xf32, #tpu.memory_space<vmem>>, %arg2: memref<32x2xf32, #tpu.memory_space<vmem>>, %arg3: memref<32x1xf32, #tpu.memory_space<vmem>>, %arg4: memref<32x32xf32, #tpu.memory_space<vmem>>, %arg5: memref<32x1xf32, #tpu.memory_space<vmem>>, %arg6: memref<32x32xf32, #tpu.memory_space<vmem>>, %arg7: memref<32x1xf32, #tpu.memory_space<vmem>>, %arg8: memref<32x2xf32, #tpu.memory_space<vmem>>, %arg9: memref<2x1xf32, #tpu.memory_space<vmem>>, %arg10: memref<256x2xf32, #tpu.memory_space<vmem>>) attributes {dimension_semantics = [#tpu.dimension_semantics<parallel>], iteration_bounds = array<i64: 4>, scalar_prefetch = 0 : i64, scratch_operands = 0 : i64, tpu.core_type = #tpu.core_type<tc>, window_params = [{transform_indices = @transform_0, window_bounds = array<i64: 256, 2>}, {pipeline_mode = #tpu.pipeline_mode<synchronous>, transform_indices = @transform_1, window_bounds = array<i64: 32, 2>}, {pipeline_mode = #tpu.pipeline_mode<synchronous>, transform_indices = @transform_2, window_bounds = array<i64: 32, 1>}, {pipeline_mode = #tpu.pipeline_mode<synchronous>, transform_indices = @transform_3, window_bounds = array<i64: 32, 32>}, {pipeline_mode = #tpu.pipeline_mode<synchronous>, transform_indices = @transform_4, window_bounds = array<i64: 32, 1>}, {pipeline_mode = #tpu.pipeline_mode<synchronous>, transform_indices = @transform_5, window_bounds = array<i64: 32, 32>}, {pipeline_mode = #tpu.pipeline_mode<synchronous>, transform_indices = @transform_6, window_bounds = array<i64: 32, 1>}, {pipeline_mode = #tpu.pipeline_mode<synchronous>, transform_indices = @transform_7, window_bounds = array<i64: 32, 2>}, {pipeline_mode = #tpu.pipeline_mode<synchronous>, transform_indices = @transform_8, window_bounds = array<i64: 2, 1>}, {transform_indices = @transform_9, window_bounds = array<i64: 256, 2>}]} {
    %c0 = arith.constant 0 : index
    %c0_0 = arith.constant 0 : index
    %0 = vector.load %arg1[%c0, %c0_0] : memref<256x2xf32, #tpu.memory_space<vmem>>, vector<256x2xf32>
    %1 = tpu.transpose %0, [1, 0] : vector<256x2xf32> -> vector<2x256xf32>
    %c0_1 = arith.constant 0 : index
    %c0_2 = arith.constant 0 : index
    %2 = vector.load %arg2[%c0_1, %c0_2] : memref<32x2xf32, #tpu.memory_space<vmem>>, vector<32x2xf32>
    %c0_3 = arith.constant 0 : index
    %c0_4 = arith.constant 0 : index
    %3 = vector.load %arg3[%c0_3, %c0_4] : memref<32x1xf32, #tpu.memory_space<vmem>>, vector<32x1xf32>
    %4 = vector.extract_strided_slice %2 {offsets = [0, 0], sizes = [32, 1], strides = [1, 1]} : vector<32x2xf32> to vector<32x1xf32>
    %5 = vector.extract_strided_slice %1 {offsets = [0, 0], sizes = [1, 256], strides = [1, 1]} : vector<2x256xf32> to vector<1x256xf32>
    %6 = vector.broadcast %4 : vector<32x1xf32> to vector<32x256xf32>
    %7 = vector.broadcast %5 : vector<1x256xf32> to vector<32x256xf32>
    %8 = arith.mulf %6, %7 : vector<32x256xf32>
    %9 = vector.extract_strided_slice %2 {offsets = [0, 1], sizes = [32, 1], strides = [1, 1]} : vector<32x2xf32> to vector<32x1xf32>
    %10 = vector.extract_strided_slice %1 {offsets = [1, 0], sizes = [1, 256], strides = [1, 1]} : vector<2x256xf32> to vector<1x256xf32>
    %11 = vector.broadcast %9 : vector<32x1xf32> to vector<32x256xf32>
    %12 = vector.broadcast %10 : vector<1x256xf32> to vector<32x256xf32>
    %13 = arith.mulf %11, %12 : vector<32x256xf32>
    %14 = arith.addf %8, %13 : vector<32x256xf32>
    %15 = vector.broadcast %3 : vector<32x1xf32> to vector<32x256xf32>
    %16 = arith.addf %14, %15 : vector<32x256xf32>
    %17 = math.tanh %16 : vector<32x256xf32>
    %c0_5 = arith.constant 0 : index
    %c0_6 = arith.constant 0 : index
    %18 = vector.load %arg4[%c0_5, %c0_6] : memref<32x32xf32, #tpu.memory_space<vmem>>, vector<32x32xf32>
    %c0_7 = arith.constant 0 : index
    %c0_8 = arith.constant 0 : index
    %19 = vector.load %arg5[%c0_7, %c0_8] : memref<32x1xf32, #tpu.memory_space<vmem>>, vector<32x1xf32>
    %cst = arith.constant dense<0.000000e+00> : vector<32x256xf32>
    %20 = tpu.matmul %18, %17, %cst {dimension_numbers = #tpu.dot_dimension_numbers<[1], [0], [0], [1], [0, 0, 1, 1], [], []>} : vector<32x32xf32>, vector<32x256xf32>, vector<32x256xf32> -> vector<32x256xf32>
    %21 = vector.broadcast %19 : vector<32x1xf32> to vector<32x256xf32>
    %22 = arith.addf %20, %21 : vector<32x256xf32>
    %23 = math.tanh %22 : vector<32x256xf32>
    %c0_9 = arith.constant 0 : index
    %c0_10 = arith.constant 0 : index
    %24 = vector.load %arg6[%c0_9, %c0_10] : memref<32x32xf32, #tpu.memory_space<vmem>>, vector<32x32xf32>
    %c0_11 = arith.constant 0 : index
    %c0_12 = arith.constant 0 : index
    %25 = vector.load %arg7[%c0_11, %c0_12] : memref<32x1xf32, #tpu.memory_space<vmem>>, vector<32x1xf32>
    %cst_13 = arith.constant dense<0.000000e+00> : vector<32x256xf32>
    %26 = tpu.matmul %24, %23, %cst_13 {dimension_numbers = #tpu.dot_dimension_numbers<[1], [0], [0], [1], [0, 0, 1, 1], [], []>} : vector<32x32xf32>, vector<32x256xf32>, vector<32x256xf32> -> vector<32x256xf32>
    %27 = vector.broadcast %25 : vector<32x1xf32> to vector<32x256xf32>
    %28 = arith.addf %26, %27 : vector<32x256xf32>
    %29 = math.tanh %28 : vector<32x256xf32>
    %c0_14 = arith.constant 0 : index
    %c0_15 = arith.constant 0 : index
    %30 = vector.load %arg8[%c0_14, %c0_15] : memref<32x2xf32, #tpu.memory_space<vmem>>, vector<32x2xf32>
    %c0_16 = arith.constant 0 : index
    %c0_17 = arith.constant 0 : index
    %31 = vector.load %arg9[%c0_16, %c0_17] : memref<2x1xf32, #tpu.memory_space<vmem>>, vector<2x1xf32>
    %32 = vector.extract_strided_slice %30 {offsets = [0, 0], sizes = [32, 1], strides = [1, 1]} : vector<32x2xf32> to vector<32x1xf32>
    %33 = vector.broadcast %32 : vector<32x1xf32> to vector<32x256xf32>
    %34 = arith.mulf %33, %29 : vector<32x256xf32>
    %35 = vector.extract_strided_slice %34 {offsets = [0, 0], sizes = [8, 256], strides = [1, 1]} : vector<32x256xf32> to vector<8x256xf32>
    %36 = vector.extract_strided_slice %34 {offsets = [8, 0], sizes = [8, 256], strides = [1, 1]} : vector<32x256xf32> to vector<8x256xf32>
    %37 = arith.addf %35, %36 : vector<8x256xf32>
    %38 = vector.extract_strided_slice %34 {offsets = [16, 0], sizes = [8, 256], strides = [1, 1]} : vector<32x256xf32> to vector<8x256xf32>
    %39 = arith.addf %37, %38 : vector<8x256xf32>
    %40 = vector.extract_strided_slice %34 {offsets = [24, 0], sizes = [8, 256], strides = [1, 1]} : vector<32x256xf32> to vector<8x256xf32>
    %41 = arith.addf %39, %40 : vector<8x256xf32>
    %cst_18 = arith.constant dense<0.000000e+00> : vector<256xf32>
    %42 = vector.multi_reduction <add>, %41, %cst_18 [0] : vector<8x256xf32> to vector<256xf32>
    %43 = vector.shape_cast %42 : vector<256xf32> to vector<1x256xf32>
    %44 = vector.extract_strided_slice %31 {offsets = [0, 0], sizes = [1, 1], strides = [1, 1]} : vector<2x1xf32> to vector<1x1xf32>
    %45 = vector.broadcast %44 : vector<1x1xf32> to vector<1x256xf32>
    %46 = arith.addf %43, %45 : vector<1x256xf32>
    %47 = vector.extract_strided_slice %30 {offsets = [0, 1], sizes = [32, 1], strides = [1, 1]} : vector<32x2xf32> to vector<32x1xf32>
    %48 = vector.broadcast %47 : vector<32x1xf32> to vector<32x256xf32>
    %49 = arith.mulf %48, %29 : vector<32x256xf32>
    %50 = vector.extract_strided_slice %49 {offsets = [0, 0], sizes = [8, 256], strides = [1, 1]} : vector<32x256xf32> to vector<8x256xf32>
    %51 = vector.extract_strided_slice %49 {offsets = [8, 0], sizes = [8, 256], strides = [1, 1]} : vector<32x256xf32> to vector<8x256xf32>
    %52 = arith.addf %50, %51 : vector<8x256xf32>
    %53 = vector.extract_strided_slice %49 {offsets = [16, 0], sizes = [8, 256], strides = [1, 1]} : vector<32x256xf32> to vector<8x256xf32>
    %54 = arith.addf %52, %53 : vector<8x256xf32>
    %55 = vector.extract_strided_slice %49 {offsets = [24, 0], sizes = [8, 256], strides = [1, 1]} : vector<32x256xf32> to vector<8x256xf32>
    %56 = arith.addf %54, %55 : vector<8x256xf32>
    %cst_19 = arith.constant dense<0.000000e+00> : vector<256xf32>
    %57 = vector.multi_reduction <add>, %56, %cst_19 [0] : vector<8x256xf32> to vector<256xf32>
    %58 = vector.shape_cast %57 : vector<256xf32> to vector<1x256xf32>
    %59 = vector.extract_strided_slice %31 {offsets = [1, 0], sizes = [1, 1], strides = [1, 1]} : vector<2x1xf32> to vector<1x1xf32>
    %60 = vector.broadcast %59 : vector<1x1xf32> to vector<1x256xf32>
    %61 = arith.addf %58, %60 : vector<1x256xf32>
    %62 = tpu.concatenate %46, %61 in 0 : vector<1x256xf32>, vector<1x256xf32> -> vector<2x256xf32>
    %63 = tpu.transpose %62, [1, 0] : vector<2x256xf32> -> vector<256x2xf32>
    %c0_20 = arith.constant 0 : index
    %c0_21 = arith.constant 0 : index
    %64 = vector.load %arg10[%c0_20, %c0_21] : memref<256x2xf32, #tpu.memory_space<vmem>>, vector<256x2xf32>
    tpu.vector_store %arg10[%c0_20, %c0_21], %63 {strides = array<i32>} : memref<256x2xf32, #tpu.memory_space<vmem>>, vector<256x2xf32>,
    return
  }
  func.func @transform_0(%arg0: i32) -> (i32, i32) {
    %c0_i32 = arith.constant 0 : i32
    %c0_i32_0 = arith.constant 0 : i32
    return %arg0, %c0_i32 : i32, i32
  }
  func.func @transform_1(%arg0: i32) -> (i32, i32) {
    %c0_i32 = arith.constant 0 : i32
    %c0_i32_0 = arith.constant 0 : i32
    %c0_i32_1 = arith.constant 0 : i32
    return %c0_i32, %c0_i32_0 : i32, i32
  }
  func.func @transform_2(%arg0: i32) -> (i32, i32) {
    %c0_i32 = arith.constant 0 : i32
    %c0_i32_0 = arith.constant 0 : i32
    %c0_i32_1 = arith.constant 0 : i32
    return %c0_i32, %c0_i32_0 : i32, i32
  }
  func.func @transform_3(%arg0: i32) -> (i32, i32) {
    %c0_i32 = arith.constant 0 : i32
    %c0_i32_0 = arith.constant 0 : i32
    %c0_i32_1 = arith.constant 0 : i32
    return %c0_i32, %c0_i32_0 : i32, i32
  }
  func.func @transform_4(%arg0: i32) -> (i32, i32) {
    %c0_i32 = arith.constant 0 : i32
    %c0_i32_0 = arith.constant 0 : i32
    %c0_i32_1 = arith.constant 0 : i32
    return %c0_i32, %c0_i32_0 : i32, i32
  }
  func.func @transform_5(%arg0: i32) -> (i32, i32) {
    %c0_i32 = arith.constant 0 : i32
    %c0_i32_0 = arith.constant 0 : i32
    %c0_i32_1 = arith.constant 0 : i32
    return %c0_i32, %c0_i32_0 : i32, i32
  }
  func.func @transform_6(%arg0: i32) -> (i32, i32) {
    %c0_i32 = arith.constant 0 : i32
    %c0_i32_0 = arith.constant 0 : i32
    %c0_i32_1 = arith.constant 0 : i32
    return %c0_i32, %c0_i32_0 : i32, i32
  }
  func.func @transform_7(%arg0: i32) -> (i32, i32) {
    %c0_i32 = arith.constant 0 : i32
    %c0_i32_0 = arith.constant 0 : i32
    %c0_i32_1 = arith.constant 0 : i32
    return %c0_i32, %c0_i32_0 : i32, i32
  }
  func.func @transform_8(%arg0: i32) -> (i32, i32) {
    %c0_i32 = arith.constant 0 : i32
    %c0_i32_0 = arith.constant 0 : i32
    %c0_i32_1 = arith.constant 0 : i32
    return %c0_i32, %c0_i32_0 : i32, i32
  }
  func.func @transform_9(%arg0: i32) -> (i32, i32) {
    %c0_i32 = arith.constant 0 : i32
    %c0_i32_0 = arith.constant 0 : i32
    return %arg0, %c0_i32 : i32, i32
  }
}

</mosaic_0001>

<bundles_post_ra>
// kernel: dnn_forward.1
= control target key start
LH: loop header
LB: loop body
LE: loop exit
PB: predicated region body
PF: predicated region fallthrough
CT: control target
= control target key end

     0   :  { %s1648_s30 = smov 0   ;;  %s1650_s10 = smov 0   ;;  %s2066_s0 = inlined_call_operand.vmem [shape: f32[1000,2], index: 0, kind: input, shape index: {}]   ;;  %s2067_s1 = inlined_call_operand.vmem [shape: f32[32,2], index: 1, kind: input, shape index: {}]   ;;  %s2068_s2 = inlined_call_operand.vmem [shape: f32[32,1], index: 2, kind: input, shape index: {}]   ;;  %s2069_s3 = inlined_call_operand.vmem [shape: f32[32,32], index: 3, kind: input, shape index: {}]   ;;  %s2070_s4 = inlined_call_operand.vmem [shape: f32[32,1], index: 4, kind: input, shape index: {}]   ;;  %s2071_s5 = inlined_call_operand.vmem [shape: f32[32,32], index: 5, kind: input, shape index: {}]   ;;  %s2072_s6 = inlined_call_operand.vmem [shape: f32[32,1], index: 6, kind: input, shape index: {}]   ;;  %s2073_s7 = inlined_call_operand.vmem [shape: f32[32,2], index: 7, kind: input, shape index: {}]   ;;  %s2074_s8 = inlined_call_operand.vmem [shape: f32[2,1], index: 8, kind: input, shape index: {}]   ;;  %s2075_s9 = inlined_call_operand.vmem [shape: f32[1000,2], index: 9, kind: output, shape index: {}]  }
   0x1   :  { %s1652_s11 = smov 0  }
   0x2 LB: > { %s1661_s12 = sadd.s32 4294967295, %s1562_s11   ;;  %s1663_s13 = sadd.s32 1, %s1562_s11   ;;  %s1562_s11 = sphi %s1652_s11, %s2084_s11   ;;  %s1558_s10 = sphi %s1650_s10, %s2083_s10   ;;  %s1554_s30 = sphi %s1648_s30, %s2082_s30  }
   0x3   : > { %s217_s14 = ssub.s32 %s1562_s11, %s1663_s13  ;;  %s220_s15 = sadd.s32 1, %s1558_s10 }
   0x4   : > { %p218_p0 = scmp.eq.s32.totalorder %s217_s14, 0  ;;  %p230_p1 = scmp.ne.s32.totalorder %s1558_s10, %s1554_s30 }
   0x5   : > { %p231_p2 = scmp.eq.s32.totalorder %s1661_s12, 3  ;;  %p1316_p3 = scmp.ge.s32.totalorder %s1562_s11, 1 }
   0x6   : > { %s1671_s16 = scalar_select %p218_p0, %s1558_s10, %s220_s15  }
   0x7   : > { %p1673_p4 = por %p231_p2, %p230_p1  ;;  %p296_p5 = scmp.lt.s32.totalorder %s1562_s11, 5 }
   0x9   : > { %p297_p6 = pnand %p1316_p3, %p296_p5 }
   0xa   : > { %s1703_s11 = sshll.u32 (!%p297_p6), %s1661_s12, 5  ;;  %s332_s25 = sand.u32 (!%p297_p6), 1, %s1554_s30  }
   0xb   : > { %300 = sbr.rel (%p297_p6) target bundleno = 985 (0x3d9), region = 56  ;;  %p340_p7 = scmp.lt.s32.totalorder (!%p297_p6), %s1703_s11, 124 }
   0xc   : > { %s1317_s26 = sshll.u32 (!%p297_p6), %s332_s25, 8 }
   0xd   : > { %s1858_s27 = scalar_lea.vmem (!%p297_p6), [#allocation2], %s1317_s26  }
  0x10   : > { %v452_v0 = vld [vmem:[%s2067_s1 + $0x10] sm:$0xff]  ;;  %v451_v1 = vld [vmem:[%s2067_s1 + $0x8] sm:$0xff]  ;;  %v1596_v2 = vmov 0   ;;  %v1597_v3 = vmov 1   ;;  %v457_v4 = vld [vmem:[%s2068_s2 + $0x18] sm:$0xff]  ;;  %s341_s18 = scalar_select %p340_p7, %s1703_s11, 124 }
  0x11   : > { %1451 = vset.pattern.permute.xlu2 %v1596_v2  ;;  %1449 = vset.pattern.permute.xlu1 %v1596_v2  ;;  %v450_v5 = vld [vmem:[%s2067_s1] sm:$0xff]  ;;  %v456_v6 = vld [vmem:[%s2068_s2 + $0x10] sm:$0xff]  ;;  %v455_v7 = vld [vmem:[%s2068_s2 + $0x8] sm:$0xff]  ;;  %vm586_vm0 = vcmask 261120   ;;  %vm873_vm1 = vcmask 1040384   ;;  %vm940_vm2 = vcmask 15360  }
  0x12   : > { %470 = vperm.xlu1 %1449, %v452_v0   ;;  %465 = vperm.xlu2 %1451, %v451_v1   ;;  %v453_v8 = vld [vmem:[%s2067_s1 + $0x18] sm:$0xff]  ;;  %s1319_s19 = sshll.u32 %s341_s18, 3  ;;  %v454_v11 = vld [vmem:[%s2068_s2] sm:$0xff]  ;;  %v564_v17 = vld [vmem:[%s2070_s4 + $0x10] sm:$0xff]  ;;  %s981_s30 = ssub.s32 (%p1673_p4), 125, %s1703_s11 }
  0x13   : > { %1447 = vset.pattern.permute.xlu0 %v1596_v2  ;;  %s1714_s22 = scalar_lea.vmem %s2066_s0, %s1319_s19  ;;  %v565_v14 = vld [vmem:[%s2070_s4 + $0x18] sm:$0xff]  ;;  %v563_v21 = vld [vmem:[%s2070_s4 + $0x8] sm:$0xff]  ;;  %v562_v24 = vld [vmem:[%s2070_s4] sm:$0xff]  ;;  %s1353_s28 = sshll.u32 (%p1673_p4), %s1661_s12, 8 }
  0x14   : > { %475 = vperm.xlu0 %1447, %v453_v8   ;;  %v370_v9 = vld [vmem:[%s1714_s22 + $0x80] sm:$0xff]  ;;  %v371_v10 = vld [vmem:[%s1714_s22 + $0x88] sm:$0xff]  ;;  %v372_v13 = vld [vmem:[%s1714_s22 + $0x90] sm:$0xff]  ;;  %p982_p8 = scmp.lt.s32.totalorder (%p1673_p4), %s981_s30, 32  ;;  %s1931_s15 = scalar_lea.vmem (%p1673_p4), %s2075_s9, %s1353_s28  }
  0x15   : > { %v354_v12 = vld [vmem:[%s1714_s22] sm:$0xff]  ;;  %v355_v15 = vld [vmem:[%s1714_s22 + $0x8] sm:$0xff]  ;;  %v373_v16 = vld [vmem:[%s1714_s22 + $0x98] sm:$0xff] }
  0x16   : > { %v356_v18 = vld [vmem:[%s1714_s22 + $0x10] sm:$0xff]  ;;  %v374_v19 = vld [vmem:[%s1714_s22 + $0xa0] sm:$0xff]  ;;  %v357_v20 = vld [vmem:[%s1714_s22 + $0x18] sm:$0xff] }
  0x17   : > { %v375_v22 = vld [vmem:[%s1714_s22 + $0xa8] sm:$0xff]  ;;  %v358_v23 = vld [vmem:[%s1714_s22 + $0x20] sm:$0xff]  ;;  %v376_v25 = vld [vmem:[%s1714_s22 + $0xb0] sm:$0xff] }
  0x18   : > { %v359_v26 = vld [vmem:[%s1714_s22 + $0x28] sm:$0xff]  ;;  %v377_v27 = vld [vmem:[%s1714_s22 + $0xb8] sm:$0xff]  ;;  %v360_v28 = vld [vmem:[%s1714_s22 + $0x30] sm:$0xff] }
  0x19   : > { %v378_v29 = vld [vmem:[%s1714_s22 + $0xc0] sm:$0xff]  ;;  %v361_v30 = vld [vmem:[%s1714_s22 + $0x38] sm:$0xff]  ;;  %v379_v31 = vld [vmem:[%s1714_s22 + $0xc8] sm:$0xff] }
  0x1a   : > { %1450 = vset.pattern.permute.xlu1 %v1597_v3  ;;  %1452 = vset.pattern.permute.xlu2 %v1597_v3  ;;  %v362_v32 = vld [vmem:[%s1714_s22 + $0x40] sm:$0xff]  ;;  %v380_v33 = vld [vmem:[%s1714_s22 + $0xd0] sm:$0xff]  ;;  %v363_v34 = vld [vmem:[%s1714_s22 + $0x48] sm:$0xff] }
  0x1b   : > { %497 = vperm.xlu1 %1450, %v452_v0   ;;  %493 = vperm.xlu2 %1452, %v451_v1   ;;  %v381_v35 = vld [vmem:[%s1714_s22 + $0xd8] sm:$0xff]  ;;  %v364_v36 = vld [vmem:[%s1714_s22 + $0x50] sm:$0xff]  ;;  %v382_v37 = vld [vmem:[%s1714_s22 + $0xe0] sm:$0xff] }
  0x1c   : > { %1448 = vset.pattern.permute.xlu0 %v1597_v3  ;;  %v365_v38 = vld [vmem:[%s1714_s22 + $0x58] sm:$0xff]  ;;  %v383_v39 = vld [vmem:[%s1714_s22 + $0xe8] sm:$0xff]  ;;  %v366_v40 = vld [vmem:[%s1714_s22 + $0x60] sm:$0xff] }
  0x1d   : > { %501 = vperm.xlu0 %1448, %v453_v8   ;;  %v384_v41 = vld [vmem:[%s1714_s22 + $0xf0] sm:$0xff]  ;;  %v367_v43 = vld [vmem:[%s1714_s22 + $0x68] sm:$0xff]  ;;  %v385_v44 = vld [vmem:[%s1714_s22 + $0xf8] sm:$0xff] }
  0x1e   : > { %v368_v45 = vld [vmem:[%s1714_s22 + $0x70] sm:$0xff]  ;;  %v369_v48 = vld [vmem:[%s1714_s22 + $0x78] sm:$0xff] }
  0x23   : > { %1453 = vset.pattern.permute.xlu1 %v1596_v2  ;;  %1454 = vset.pattern.permute.xlu2 %v1596_v2 }
  0x24   : > { %539 = vperm.xlu1 %1453, %v457_v4   ;;  %460 = vperm.xlu2 %1454, %v450_v5  }
  0x25   : > { %489 = vperm.xlu0 %1448, %v450_v5  }
  0x2c   : > { %534 = vperm.xlu1 %1453, %v456_v6   ;;  %529 = vperm.xlu2 %1454, %v455_v7  }
  0x2d   : > { %1455 = vset.pattern.permute.xlu0 %v1596_v2 }
  0x2e   : > { %524 = vperm.xlu0 %1455, %v454_v11  }
  0x36   : > { %583 = vperm.xlu0 %1455, %v565_v14  }
  0x3e   : > { %578 = vperm.xlu0 %1455, %v564_v17  }
  0x46   : > { %573 = vperm.xlu0 %1455, %v563_v21  }
  0x4e   : > { %568 = vperm.xlu0 %1455, %v562_v24  }
  0x52   : > { %418 = vxpose.xlu2.b32.start [1/16] (narrow) %v370_v9, 8 }
  0x56   : > { %1456 = vset.pattern.permute.xlu0 %v1597_v3 }
  0x5a   : > { %419 = vxpose.xlu2.b32.cont [2/16] (narrow) %v371_v10, 8 }
  0x61   : > { %386 = vxpose.xlu1.b32.start [1/16] (narrow) %v354_v12, 8 }
  0x62   : > { %420 = vxpose.xlu2.b32.cont [3/16] (narrow) %v372_v13, 8 }
  0x69   : > { %387 = vxpose.xlu1.b32.cont [2/16] (narrow) %v355_v15, 8 }
  0x6a   : > { %421 = vxpose.xlu2.b32.cont [4/16] (narrow) %v373_v16, 8 }
  0x6c   : > { %v466_v42 = vpop.permute.xlu2 %465 }
  0x71   : > { %388 = vxpose.xlu1.b32.cont [3/16] (narrow) %v356_v18, 8  ;;  %v558_v18 = vld [vmem:[%s2069_s3] sm:$0xff] }
  0x72   : > { %422 = vxpose.xlu2.b32.cont [5/16] (narrow) %v374_v19, 8 }
  0x75   : > { %v494_v46 = vpop.permute.xlu2 %493 }
  0x79   : > { %389 = vxpose.xlu1.b32.cont [4/16] (narrow) %v357_v20, 8 }
  0x7a   : > { %423 = vxpose.xlu2.b32.cont [6/16] (narrow) %v375_v22, 8 }
  0x7e   : > { %v461_v50 = vpop.permute.xlu2 %460 }
  0x81   : > { %390 = vxpose.xlu1.b32.cont [5/16] (narrow) %v358_v23, 8 }
  0x82   : > { %424 = vxpose.xlu2.b32.cont [7/16] (narrow) %v376_v25, 8 }
  0x84   : > { %v471_v47 = vpop.permute.xlu1 %470 }
  0x86   : > { %v476_v49 = vpop.permute.xlu0 %475  ;;  %v530_v53 = vpop.permute.xlu2 %529 }
  0x89   : > { %391 = vxpose.xlu1.b32.cont [6/16] (narrow) %v359_v26, 8 }
  0x8a   : > { %425 = vxpose.xlu2.b32.cont [8/16] (narrow) %v377_v27, 8 }
  0x8d   : > { %v498_v51 = vpop.permute.xlu1 %497 }
  0x8f   : > { %v502_v52 = vpop.permute.xlu0 %501 }
  0x91   : > { %392 = vxpose.xlu1.b32.cont [7/16] (narrow) %v360_v28, 8 }
  0x92   : > { %426 = vxpose.xlu2.b32.cont [9/16] (narrow) %v378_v29, 8  ;;  %v559_v29 = vld [vmem:[%s2069_s3 + $0x8] sm:$0xff] }
  0x96   : > { %v540_v54 = vpop.permute.xlu1 %539 }
  0x97   : > { %v490_v55 = vpop.permute.xlu0 %489 }
  0x99   : > { %393 = vxpose.xlu1.b32.cont [8/16] (narrow) %v361_v30, 8 }
  0x9a   : > { %427 = vxpose.xlu2.b32.cont [10/16] (narrow) %v379_v31, 8 }
  0x9e   : > { %v535_v8 = vpop.permute.xlu1 %534 }
  0xa0   : > { %v525_v12 = vpop.permute.xlu0 %524 }
  0xa1   : > { %394 = vxpose.xlu1.b32.cont [9/16] (narrow) %v362_v32, 8 }
  0xa2   : > { %428 = vxpose.xlu2.b32.cont [11/16] (narrow) %v380_v33, 8 }
  0xa9   : > { %395 = vxpose.xlu1.b32.cont [10/16] (narrow) %v363_v34, 8 }
  0xaa   : > { %429 = vxpose.xlu2.b32.cont [12/16] (narrow) %v381_v35, 8 }
  0xb1   : > { %396 = vxpose.xlu1.b32.cont [11/16] (narrow) %v364_v36, 8 }
  0xb2   : > { %430 = vxpose.xlu2.b32.cont [13/16] (narrow) %v382_v37, 8 }
  0xb9   : > { %397 = vxpose.xlu1.b32.cont [12/16] (narrow) %v365_v38, 8 }
  0xba   : > { %431 = vxpose.xlu2.b32.cont [14/16] (narrow) %v383_v39, 8  ;;  %v560_v39 = vld [vmem:[%s2069_s3 + $0x10] sm:$0xff] }
  0xc1   : > { %398 = vxpose.xlu1.b32.cont [13/16] (narrow) %v366_v40, 8 }
  0xc2   : > { %432 = vxpose.xlu2.b32.cont [15/16] (narrow) %v384_v41, 8 }
  0xc9   : > { %399 = vxpose.xlu1.b32.cont [14/16] (narrow) %v367_v43, 8 }
  0xca   : > { %433 = vxpose.xlu2.b32.end [16/16] (narrow) %v385_v44, 8 }
  0xd1   : > { %400 = vxpose.xlu1.b32.cont [15/16] (narrow) %v368_v45, 8  ;;  %v561_v45 = vld [vmem:[%s2069_s3 + $0x18] sm:$0xff] }
  0xd9   : > { %401 = vxpose.xlu1.b32.end [16/16] (narrow) %v369_v48, 8  ;;  %v773_v48 = vld [vmem:[%s2073_s7 + $0x10] sm:$0xff] }
  0xeb   : > { %v434_v56 = vpop.trf.xlu2 }
  0xec   : > { %v479_v57 = vperm.slane %v434_v56, 0  ;;  %v505_v58 = vperm.slane %v434_v56, 1 }
  0xee   : > { %v483_v59 = vmul.f32 %v479_v57, %v466_v42  ;;  %v485_v60 = vmul.f32 %v479_v57, %v471_v47  ;;  %v509_v61 = vmul.f32 %v505_v58, %v494_v46  ;;  %v511_v62 = vmul.f32 %v505_v58, %v498_v51 }
  0xef   : > { %v487_v63 = vmul.f32 %v479_v57, %v476_v49  ;;  %v513_v0 = vmul.f32 %v505_v58, %v502_v52  ;;  %v481_v1 = vmul.f32 %v479_v57, %v461_v50  ;;  %v507_v4 = vmul.f32 %v505_v58, %v490_v55  ;;  %v774_v58 = vld [vmem:[%s2073_s7 + $0x18] sm:$0xff] }
  0xf0   : > { %v519_v5 = vadd.f32 %v511_v62, %v485_v60  ;;  %v517_v7 = vadd.f32 %v509_v61, %v483_v59 }
  0xf1   : > { %v521_v6 = vadd.f32 %v513_v0, %v487_v63  ;;  %v515_v10 = vadd.f32 %v507_v4, %v481_v1  ;;  %v775_v0 = vld [vmem:[%s2074_s8] sm:$0x3] }
  0xf2   : > { %v547_v11 = vadd.f32 %v535_v8, %v519_v5  ;;  %v545_v13 = vadd.f32 %v530_v53, %v517_v7 }
  0xf3   : > { %v549_v9 = vadd.f32 %v540_v54, %v521_v6  ;;  %v543_v14 = vadd.f32 %v525_v12, %v515_v10 }
  0xf5   : > { %1460 = vtanh.f32 %v549_v9  ;;  %v665_v9 = vld [vmem:[%s2071_s5] sm:$0xff] }
  0xf6   : > { %1462 = vtanh.f32 %v547_v11 }
  0xf7   : > { %1464 = vtanh.f32 %v545_v13 }
  0xf8   : > { %1466 = vtanh.f32 %v543_v14 }
  0xfb   : > { %v1461_v15 = vpop.eup %1460 }
  0xfc   : > { %640 = vmatpush.msra.mxu1 %v1461_v15  ;;  %v1463_v16 = vpop.eup %1462 }
  0xfd   : > { %v1465_v17 = vpop.eup %1464 }
  0xfe   : > { %641 = vmatpush.msra.mxu1 %v1463_v16  ;;  %v1467_v19 = vpop.eup %1466 }
 0x100   : > { %642 = vmatpush.msra.mxu1 %v1465_v17 }
 0x102   : > { %643 = vmatpush.msra.mxu1 %v1467_v19 }
 0x103   : > { %1324 = vmatmul.msk.f32.vlgmr.msra.gmra.mxu1 %vm586_vm0, %v558_v18 }
 0x105   : > { %v402_v20 = vpop.trf.xlu1 }
 0x106   : > { %v478_v21 = vperm.slane %v402_v20, 0  ;;  %v504_v22 = vperm.slane %v402_v20, 1 }
 0x108   : > { %v480_v23 = vmul.f32 %v478_v21, %v461_v50  ;;  %v482_v24 = vmul.f32 %v478_v21, %v466_v42  ;;  %v484_v25 = vmul.f32 %v478_v21, %v471_v47  ;;  %v506_v26 = vmul.f32 %v504_v22, %v490_v55  ;;  %v771_v42 = vld [vmem:[%s2073_s7] sm:$0xff]  ;;  %v772_v47 = vld [vmem:[%s2073_s7 + $0x8] sm:$0xff] }
 0x109   : > { %v508_v27 = vmul.f32 %v504_v22, %v494_v46  ;;  %v510_v28 = vmul.f32 %v504_v22, %v498_v51  ;;  %v486_v30 = vmul.f32 %v478_v21, %v476_v49  ;;  %v512_v31 = vmul.f32 %v504_v22, %v502_v52  ;;  %830 = vperm.xlu0 %1456, %v771_v42   ;;  %v669_v49 = vld [vmem:[%s2072_s6] sm:$0xff]  ;;  %v670_v50 = vld [vmem:[%s2072_s6 + $0x8] sm:$0xff]  ;;  %v671_v51 = vld [vmem:[%s2072_s6 + $0x10] sm:$0xff] }
 0x10a   : > { %v514_v37 = vadd.f32 %v506_v26, %v480_v23  ;;  %v672_v52 = vld [vmem:[%s2072_s6 + $0x18] sm:$0xff] }
 0x10b   : > { %v520_v32 = vadd.f32 %v512_v31, %v486_v30  ;;  %v518_v33 = vadd.f32 %v510_v28, %v484_v25  ;;  %v516_v34 = vadd.f32 %v508_v27, %v482_v24  ;;  %1325 = vmatmul.msk.f32.gmra.mxu1 %vm586_vm0, %v559_v29  ;;  %v668_v22 = vld [vmem:[%s2071_s5 + $0x18] sm:$0xff] }
 0x10c   : > { %v542_v40 = vadd.f32 %v525_v12, %v514_v37  ;;  %v666_v12 = vld [vmem:[%s2071_s5 + $0x8] sm:$0xff] }
 0x10d   : > { %v548_v35 = vadd.f32 %v540_v54, %v520_v32  ;;  %v546_v36 = vadd.f32 %v535_v8, %v518_v33  ;;  %v544_v38 = vadd.f32 %v530_v53, %v516_v34 }
 0x10f   : > { %1468 = vtanh.f32 %v548_v35 }
 0x110   : > { %1470 = vtanh.f32 %v546_v36 }
 0x111   : > { %1472 = vtanh.f32 %v544_v38  ;;  %834 = vperm.xlu0 %1456, %v772_v47  }
 0x112   : > { %1474 = vtanh.f32 %v542_v40 }
 0x113   : > { %1326 = vmatmul.msk.f32.gmra.mxu1 %vm586_vm0, %v560_v39 }
 0x115   : > { %v1469_v41 = vpop.eup %1468 }
 0x116   : > { %611 = vmatpush.msra.mxu0 %v1469_v41  ;;  %v1471_v43 = vpop.eup %1470 }
 0x117   : > { %v1473_v44 = vpop.eup %1472 }
 0x118   : > { %612 = vmatpush.msra.mxu0 %v1471_v43  ;;  %v1475_v46 = vpop.eup %1474 }
 0x119   : > { %838 = vperm.xlu0 %1456, %v773_v48  }
 0x11a   : > { %613 = vmatpush.msra.mxu0 %v1473_v44 }
 0x11b   : > { %1327 = vmatmul.msk.f32.gmra.mxu1 %vm586_vm0, %v561_v45 }
 0x11c   : > { %614 = vmatpush.msra.mxu0 %v1475_v46 }
 0x11d   : > { %1320 = vmatmul.msk.f32.vlgmr.msra.gmra.mxu0 %vm586_vm0, %v558_v18  ;;  %v667_v18 = vld [vmem:[%s2071_s5 + $0x10] sm:$0xff] }
 0x121   : > { %1457 = vset.pattern.permute.xlu0 %v1596_v2  ;;  %v584_v2 = vpop.permute.xlu0 %583 }
 0x122   : > { %675 = vperm.xlu0 %1457, %v669_v49  }
 0x125   : > { %1321 = vmatmul.msk.f32.gmra.mxu0 %vm586_vm0, %v559_v29 }
 0x129   : > { %v579_v54 = vpop.permute.xlu0 %578 }
 0x12a   : > { %680 = vperm.xlu0 %1457, %v670_v50  }
 0x12c   : > { %1458 = vset.pattern.permute.xlu2 %v1597_v3 }
 0x12d   : > { %1322 = vmatmul.msk.f32.gmra.mxu0 %vm586_vm0, %v560_v39 }
 0x131   : > { %v574_v57 = vpop.permute.xlu0 %573 }
 0x132   : > { %685 = vperm.xlu0 %1457, %v671_v51  }
 0x133   : > { %842 = vperm.xlu2 %1458, %v774_v58  }
 0x135   : > { %1323 = vmatmul.msk.f32.gmra.mxu0 %vm586_vm0, %v561_v45 }
 0x139   : > { %v569_v1 = vpop.permute.xlu0 %568 }
 0x13a   : > { %690 = vperm.xlu0 %1457, %v672_v52  }
 0x142   : > { %778 = vperm.xlu0 %1457, %v771_v42  }
 0x14a   : > { %783 = vperm.xlu0 %1457, %v772_v47  }
 0x152   : > { %788 = vperm.xlu0 %1457, %v773_v48  }
 0x15a   : > { %793 = vperm.xlu0 %1457, %v774_v58  }
 0x162   : > { %824 = vperm.xlu0 %1457, %v775_v0  }
 0x17b   : > { %v1834_v24 = vpop.permute.xlu0 %830 }
 0x180   : > { %v645_v53 = vpop.f32.mrf.mxu1 }
 0x181   : > { %v646_v4 = vadd.f32 %v645_v53, %v569_v1 }
 0x183   : > { %v1836_v25 = vpop.permute.xlu0 %834 }
 0x188   : > { %v648_v55 = vpop.f32.mrf.mxu1 }
 0x189   : > { %v649_v63 = vadd.f32 %v648_v55, %v574_v57 }
 0x18b   : > { %v1838_v26 = vpop.permute.xlu0 %838 }
 0x18d   : > { %v843_v52 = vpop.permute.xlu2 %842 }
 0x190   : > { %v651_v56 = vpop.f32.mrf.mxu1 }
 0x191   : > { %v652_v60 = vadd.f32 %v651_v56, %v579_v54 }
 0x194   : > { %v676_v27 = vpop.permute.xlu0 %675 }
 0x198   : > { %v654_v59 = vpop.f32.mrf.mxu1 }
 0x199   : > { %v655_v61 = vadd.f32 %v654_v59, %v584_v2 }
 0x19a   : > { %v616_v62 = vpop.f32.mrf.mxu0 }
 0x19b   : > { %1476 = vtanh.f32 %v655_v61  ;;  %v617_v17 = vadd.f32 %v616_v62, %v569_v1 }
 0x19c   : > { %1478 = vtanh.f32 %v652_v60  ;;  %v681_v28 = vpop.permute.xlu0 %680 }
 0x19d   : > { %1480 = vtanh.f32 %v649_v63 }
 0x19e   : > { %1482 = vtanh.f32 %v646_v4 }
 0x1a1   : > { %v1477_v5 = vpop.eup %1476 }
 0x1a2   : > { %v619_v6 = vpop.f32.mrf.mxu0  ;;  %746 = vmatpush.msra.mxu3 %v1477_v5  ;;  %v1479_v7 = vpop.eup %1478 }
 0x1a3   : > { %v1481_v8 = vpop.eup %1480  ;;  %v620_v16 = vadd.f32 %v619_v6, %v574_v57 }
 0x1a4   : > { %747 = vmatpush.msra.mxu3 %v1479_v7  ;;  %v1483_v10 = vpop.eup %1482  ;;  %v686_v29 = vpop.permute.xlu0 %685 }
 0x1a6   : > { %748 = vmatpush.msra.mxu3 %v1481_v8 }
 0x1a8   : > { %749 = vmatpush.msra.mxu3 %v1483_v10 }
 0x1a9   : > { %1332 = vmatmul.msk.f32.vlgmr.msra.gmra.mxu3 %vm586_vm0, %v665_v9 }
 0x1aa   : > { %v622_v11 = vpop.f32.mrf.mxu0 }
 0x1ab   : > { %v623_v14 = vadd.f32 %v622_v11, %v579_v54 }
 0x1ac   : > { %v691_v30 = vpop.permute.xlu0 %690 }
 0x1b1   : > { %1333 = vmatmul.msk.f32.gmra.mxu3 %vm586_vm0, %v666_v12 }
 0x1b2   : > { %v625_v13 = vpop.f32.mrf.mxu0 }
 0x1b3   : > { %v626_v15 = vadd.f32 %v625_v13, %v584_v2 }
 0x1b4   : > { %v1840_v32 = vpop.permute.xlu0 %778 }
 0x1b5   : > { %1484 = vtanh.f32 %v626_v15 }
 0x1b6   : > { %1486 = vtanh.f32 %v623_v14 }
 0x1b7   : > { %1488 = vtanh.f32 %v620_v16 }
 0x1b8   : > { %1490 = vtanh.f32 %v617_v17 }
 0x1b9   : > { %1334 = vmatmul.msk.f32.gmra.mxu3 %vm586_vm0, %v667_v18 }
 0x1bb   : > { %v1485_v19 = vpop.eup %1484 }
 0x1bc   : > { %717 = vmatpush.msra.mxu2 %v1485_v19  ;;  %v1487_v20 = vpop.eup %1486  ;;  %v1842_v34 = vpop.permute.xlu0 %783 }
 0x1bd   : > { %v1489_v21 = vpop.eup %1488 }
 0x1be   : > { %718 = vmatpush.msra.mxu2 %v1487_v20  ;;  %v1491_v23 = vpop.eup %1490 }
 0x1c0   : > { %719 = vmatpush.msra.mxu2 %v1489_v21 }
 0x1c1   : > { %1335 = vmatmul.msk.f32.gmra.mxu3 %vm586_vm0, %v668_v22 }
 0x1c2   : > { %720 = vmatpush.msra.mxu2 %v1491_v23 }
 0x1c3   : > { %1328 = vmatmul.msk.f32.vlgmr.msra.gmra.mxu2 %vm586_vm0, %v665_v9 }
 0x1c4   : > { %v789_v39 = vpop.permute.xlu0 %788 }
 0x1cb   : > { %1329 = vmatmul.msk.f32.gmra.mxu2 %vm586_vm0, %v666_v12 }
 0x1cc   : > { %v794_v55 = vpop.permute.xlu0 %793 }
 0x1d3   : > { %1330 = vmatmul.msk.f32.gmra.mxu2 %vm586_vm0, %v667_v18 }
 0x1d4   : > { %v825_v17 = vpop.permute.xlu0 %824 }
 0x1db   : > { %1331 = vmatmul.msk.f32.gmra.mxu2 %vm586_vm0, %v668_v22 }
 0x22c   : > { %v751_v31 = vpop.f32.mrf.mxu3 }
 0x22d   : > { %v752_v36 = vadd.f32 %v751_v31, %v676_v27 }
 0x234   : > { %v754_v33 = vpop.f32.mrf.mxu3 }
 0x235   : > { %v755_v35 = vadd.f32 %v754_v33, %v681_v28 }
 0x237   : > { %1492 = vtanh.f32 %v755_v35 }
 0x238   : > { %1494 = vtanh.f32 %v752_v36 }
 0x23c   : > { %v757_v37 = vpop.f32.mrf.mxu3 }
 0x23d   : > { %v758_v38 = vadd.f32 %v757_v37, %v686_v29  ;;  %v1493_v41 = vpop.eup %1492 }
 0x23e   : > { %v1495_v44 = vpop.eup %1494  ;;  %v799_v46 = vmul.f32 %v1493_v41, %v1842_v34  ;;  %v848_v47 = vmul.f32 %v1493_v41, %v1836_v25 }
 0x23f   : > { %1496 = vtanh.f32 %v758_v38  ;;  %v797_v48 = vmul.f32 %v1495_v44, %v1840_v32  ;;  %v846_v49 = vmul.f32 %v1495_v44, %v1834_v24 }
 0x241   : > { %v805_v2 = vadd.f32 %v799_v46, %v797_v48  ;;  %v854_v53 = vadd.f32 %v848_v47, %v846_v49 }
 0x244   : > { %v760_v40 = vpop.f32.mrf.mxu3 }
 0x245   : > { %v761_v42 = vadd.f32 %v760_v40, %v691_v30  ;;  %v1497_v45 = vpop.eup %1496 }
 0x246   : > { %v722_v43 = vpop.f32.mrf.mxu2  ;;  %v801_v50 = vmul.f32 %v1497_v45, %v789_v39  ;;  %v850_v51 = vmul.f32 %v1497_v45, %v1838_v26 }
 0x247   : > { %1498 = vtanh.f32 %v761_v42  ;;  %v723_v6 = vadd.f32 %v722_v43, %v676_v27 }
 0x248   : > { %v807_v57 = vadd.f32 %v805_v2, %v801_v50  ;;  %v856_v59 = vadd.f32 %v854_v53, %v850_v51 }
 0x24d   : > { %v1499_v54 = vpop.eup %1498 }
 0x24e   : > { %v725_v56 = vpop.f32.mrf.mxu2  ;;  %v803_v58 = vmul.f32 %v1499_v54, %v794_v55  ;;  %v852_v60 = vmul.f32 %v1499_v54, %v843_v52 }
 0x24f   : > { %v726_v5 = vadd.f32 %v725_v56, %v681_v28 }
 0x250   : > { %v809_v61 = vadd.f32 %v807_v57, %v803_v58  ;;  %v858_v62 = vadd.f32 %v856_v59, %v852_v60 }
 0x251   : > { %1500 = vtanh.f32 %v726_v5 }
 0x252   : > { %v816_v63 = vrot.slane %v809_v61, 4  ;;  %v865_v0 = vrot.slane %v858_v62, 4  ;;  %1502 = vtanh.f32 %v723_v6 }
 0x254   : > { %v817_v1 = vadd.f32 %v816_v63, %v809_v61  ;;  %v866_v4 = vadd.f32 %v865_v0, %v858_v62 }
 0x256   : > { %v728_v7 = vpop.f32.mrf.mxu2  ;;  %v867_v8 = vrot.slane %v866_v4, 2  ;;  %v818_v10 = vrot.slane %v817_v1, 2 }
 0x257   : > { %v729_v9 = vadd.f32 %v728_v7, %v686_v29  ;;  %v1501_v19 = vpop.eup %1500 }
 0x258   : > { %v868_v11 = vadd.f32 %v867_v8, %v866_v4  ;;  %v819_v12 = vadd.f32 %v818_v10, %v817_v1  ;;  %v1503_v23 = vpop.eup %1502  ;;  %v798_v29 = vmul.f32 %v1501_v19, %v1842_v34  ;;  %v847_v31 = vmul.f32 %v1501_v19, %v1836_v25 }
 0x259   : > { %1504 = vtanh.f32 %v729_v9  ;;  %v796_v33 = vmul.f32 %v1503_v23, %v1840_v32  ;;  %v845_v35 = vmul.f32 %v1503_v23, %v1834_v24 }
 0x25a   : > { %v869_v13 = vrot.slane %v868_v11, 1  ;;  %v820_v14 = vrot.slane %v819_v12, 1 }
 0x25b   : > { %v853_v38 = vadd.f32 %v847_v31, %v845_v35 }
 0x25c   : > { %v821_v15 = vadd.f32 %v820_v14, %v819_v12  ;;  %v870_v16 = vadd.f32 %v869_v13, %v868_v11 }
 0x25e   : > { %v731_v18 = vpop.f32.mrf.mxu2  ;;  %v828_v21 = vadd.f32 %v825_v17, %v821_v15  ;;  %v872_v22 = vadd.f32 %v870_v16, %v825_v17 }
 0x25f   : > { %v732_v20 = vadd.f32 %v731_v18, %v691_v30  ;;  %v1505_v27 = vpop.eup %1504  ;;  %v804_v30 = vadd.f32 %v798_v29, %v796_v33 }
 0x260   : > { %v875_v28 = vsel %vm873_vm1, %v828_v21, %v872_v22  ;;  %v800_v36 = vmul.f32 %v1505_v27, %v789_v39  ;;  %v849_v37 = vmul.f32 %v1505_v27, %v1838_v26 }
 0x261   : > { %1506 = vtanh.f32 %v732_v20  ;;  %908 = vxpose.xlu0.b32.start.end [1/1] (short) %v875_v28, 128 }
 0x262   : > { %v806_v41 = vadd.f32 %v804_v30, %v800_v36  ;;  %v855_v42 = vadd.f32 %v853_v38, %v849_v37 }
 0x267   : > { %v1507_v40 = vpop.eup %1506 }
 0x268   : > { %v802_v43 = vmul.f32 %v1507_v40, %v794_v55  ;;  %v851_v44 = vmul.f32 %v1507_v40, %v843_v52 }
 0x26a   : > { %v808_v45 = vadd.f32 %v806_v41, %v802_v43  ;;  %v857_v46 = vadd.f32 %v855_v42, %v851_v44 }
 0x26c   : > { %v810_v34 = vrot.slane %v808_v45, 4  ;;  %v859_v47 = vrot.slane %v857_v46, 4 }
 0x26e   : > { %v811_v25 = vadd.f32 %v810_v34, %v808_v45  ;;  %v860_v48 = vadd.f32 %v859_v47, %v857_v46 }
 0x270   : > { %v812_v32 = vrot.slane %v811_v25, 2  ;;  %v861_v49 = vrot.slane %v860_v48, 2 }
 0x272   : > { %v813_v24 = vadd.f32 %v812_v32, %v811_v25  ;;  %v862_v39 = vadd.f32 %v861_v49, %v860_v48 }
 0x274   : > { %v814_v50 = vrot.slane %v813_v24, 1  ;;  %v863_v26 = vrot.slane %v862_v39, 1 }
 0x276   : > { %v815_v51 = vadd.f32 %v814_v50, %v813_v24  ;;  %v864_v2 = vadd.f32 %v863_v26, %v862_v39 }
 0x278   : > { %v827_v53 = vadd.f32 %v825_v17, %v815_v51  ;;  %v871_v54 = vadd.f32 %v864_v2, %v825_v17 }
 0x27a   : > { %v874_v55 = vsel %vm873_vm1, %v827_v53, %v871_v54 }
 0x27b   : > { %876 = vxpose.xlu1.b32.start.end [1/1] (short) %v874_v55, 128 }
 0x2c8   : > { %1459 = vset.pattern.permute.xlu0 %v1597_v3 }
 0x305   : > { %v924_v52 = vpop.trf.xlu0 }
 0x306   : > { %957 = vst.msk [vmem:[%s1858_s27 + $0x80] sm:$0xff] %vm940_vm2, %v924_v52 }
 0x30d   : > { %v925_v56 = vpop.trf.xlu0 }
 0x30e   : > { %958 = vst.msk [vmem:[%s1858_s27 + $0x88] sm:$0xff] %vm940_vm2, %v925_v56 }
 0x315   : > { %v926_v3 = vpop.trf.xlu0 }
 0x316   : > { %959 = vst.msk [vmem:[%s1858_s27 + $0x90] sm:$0xff] %vm940_vm2, %v926_v3 }
 0x31d   : > { %v927_v57 = vpop.trf.xlu0 }
 0x31e   : > { %960 = vst.msk [vmem:[%s1858_s27 + $0x98] sm:$0xff] %vm940_vm2, %v927_v57 }
 0x31f   : > { %v892_v58 = vpop.trf.xlu1 }
 0x320   : > { %941 = vst.msk [vmem:[%s1858_s27] sm:$0xff] %vm940_vm2, %v892_v58 }
 0x325   : > { %v928_v59 = vpop.trf.xlu0 }
 0x326   : > { %961 = vst.msk [vmem:[%s1858_s27 + $0xa0] sm:$0xff] %vm940_vm2, %v928_v59 }
 0x327   : > { %v893_v60 = vpop.trf.xlu1 }
 0x328   : > { %942 = vst.msk [vmem:[%s1858_s27 + $0x8] sm:$0xff] %vm940_vm2, %v893_v60 }
 0x32d   : > { %v929_v61 = vpop.trf.xlu0 }
 0x32e   : > { %962 = vst.msk [vmem:[%s1858_s27 + $0xa8] sm:$0xff] %vm940_vm2, %v929_v61 }
 0x32f   : > { %v894_v62 = vpop.trf.xlu1 }
 0x330   : > { %943 = vst.msk [vmem:[%s1858_s27 + $0x10] sm:$0xff] %vm940_vm2, %v894_v62 }
 0x335   : > { %v930_v63 = vpop.trf.xlu0 }
 0x336   : > { %963 = vst.msk [vmem:[%s1858_s27 + $0xb0] sm:$0xff] %vm940_vm2, %v930_v63 }
 0x337   : > { %v895_v0 = vpop.trf.xlu1 }
 0x338   : > { %944 = vst.msk [vmem:[%s1858_s27 + $0x18] sm:$0xff] %vm940_vm2, %v895_v0 }
 0x33d   : > { %v931_v1 = vpop.trf.xlu0 }
 0x33e   : > { %964 = vst.msk [vmem:[%s1858_s27 + $0xb8] sm:$0xff] %vm940_vm2, %v931_v1 }
 0x33f   : > { %v896_v4 = vpop.trf.xlu1 }
 0x340   : > { %945 = vst.msk [vmem:[%s1858_s27 + $0x20] sm:$0xff] %vm940_vm2, %v896_v4 }
 0x345   : > { %v932_v5 = vpop.trf.xlu0 }
 0x346   : > { %965 = vst.msk [vmem:[%s1858_s27 + $0xc0] sm:$0xff] %vm940_vm2, %v932_v5 }
 0x347   : > { %v897_v6 = vpop.trf.xlu1 }
 0x348   : > { %946 = vst.msk [vmem:[%s1858_s27 + $0x28] sm:$0xff] %vm940_vm2, %v897_v6 }
 0x34d   : > { %v933_v7 = vpop.trf.xlu0 }
 0x34e   : > { %966 = vst.msk [vmem:[%s1858_s27 + $0xc8] sm:$0xff] %vm940_vm2, %v933_v7 }
 0x34f   : > { %v898_v8 = vpop.trf.xlu1 }
 0x350   : > { %947 = vst.msk [vmem:[%s1858_s27 + $0x30] sm:$0xff] %vm940_vm2, %v898_v8 }
 0x355   : > { %v934_v9 = vpop.trf.xlu0 }
 0x356   : > { %967 = vst.msk [vmem:[%s1858_s27 + $0xd0] sm:$0xff] %vm940_vm2, %v934_v9 }
 0x357   : > { %v899_v10 = vpop.trf.xlu1 }
 0x358   : > { %948 = vst.msk [vmem:[%s1858_s27 + $0x38] sm:$0xff] %vm940_vm2, %v899_v10 }
 0x35d   : > { %v935_v11 = vpop.trf.xlu0 }
 0x35e   : > { %968 = vst.msk [vmem:[%s1858_s27 + $0xd8] sm:$0xff] %vm940_vm2, %v935_v11 }
 0x35f   : > { %v900_v12 = vpop.trf.xlu1 }
 0x360   : > { %949 = vst.msk [vmem:[%s1858_s27 + $0x40] sm:$0xff] %vm940_vm2, %v900_v12 }
 0x365   : > { %v936_v13 = vpop.trf.xlu0 }
 0x366   : > { %969 = vst.msk [vmem:[%s1858_s27 + $0xe0] sm:$0xff] %vm940_vm2, %v936_v13 }
 0x367   : > { %v901_v14 = vpop.trf.xlu1 }
 0x368   : > { %950 = vst.msk [vmem:[%s1858_s27 + $0x48] sm:$0xff] %vm940_vm2, %v901_v14 }
 0x36d   : > { %v937_v15 = vpop.trf.xlu0 }
 0x36e   : > { %970 = vst.msk [vmem:[%s1858_s27 + $0xe8] sm:$0xff] %vm940_vm2, %v937_v15 }
 0x36f   : > { %v902_v16 = vpop.trf.xlu1 }
 0x370   : > { %951 = vst.msk [vmem:[%s1858_s27 + $0x50] sm:$0xff] %vm940_vm2, %v902_v16 }
 0x375   : > { %v938_v17 = vpop.trf.xlu0 }
 0x376   : > { %971 = vst.msk [vmem:[%s1858_s27 + $0xf0] sm:$0xff] %vm940_vm2, %v938_v17 }
 0x377   : > { %v903_v18 = vpop.trf.xlu1 }
 0x378   : > { %952 = vst.msk [vmem:[%s1858_s27 + $0x58] sm:$0xff] %vm940_vm2, %v903_v18 }
 0x37d   : > { %v939_v19 = vpop.trf.xlu0 }
 0x37e   : > { %972 = vst.msk [vmem:[%s1858_s27 + $0xf8] sm:$0xff] %vm940_vm2, %v939_v19 }
 0x37f   : > { %v904_v20 = vpop.trf.xlu1 }
 0x380   : > { %953 = vst.msk [vmem:[%s1858_s27 + $0x60] sm:$0xff] %vm940_vm2, %v904_v20 }
 0x387   : > { %v905_v21 = vpop.trf.xlu1 }
 0x388   : > { %954 = vst.msk [vmem:[%s1858_s27 + $0x68] sm:$0xff] %vm940_vm2, %v905_v21 }
 0x38f   : > { %v906_v22 = vpop.trf.xlu1 }
 0x390   : > { %955 = vst.msk [vmem:[%s1858_s27 + $0x70] sm:$0xff] %vm940_vm2, %v906_v22 }
 0x394   : > { %979 = sbr.rel (!%p1673_p4) target bundleno = 985 (0x3d9), region = 60 }
 0x397   : > { %v907_v23 = vpop.trf.xlu1 }
 0x398   : > { %956 = vst.msk [vmem:[%s1858_s27 + $0x78] sm:$0xff] %vm940_vm2, %v907_v23 }
 0x399   : > { %s2086_s30 = smov (!%p982_p8, %s981_s30), 32 }
 0x39a   : > { %s1338_s18 = sshll.u32 %s2086_s30, 3 }
 0x39b   : > { %p1341_p9 = scmp.eq.s32.totalorder %s1338_s18, 0 }
 0x39c   : > { %s1937_s19 = sshrl.u32 (!%p1341_p9), %s2086_s30, 5 }
 0x39d   : > { %990 = sbr.rel (%p1341_p9) target bundleno = 985 (0x3d9), region = 64  ;;  %p1342_p10 = scmp.le.s32.totalorder (!%p1341_p9), %s1937_s19, 0 }
 0x3a2   : > { %1269 = sbr.rel (%p1342_p10) target bundleno = 968 (0x3c8), region = 140  ;;  %s2077_s12 = smov (!%p1342_p10), %s1931_s15 }
 0x3a3   : > { %s2078_s17 = smov (!%p1342_p10), %s1858_s27  ;;  %s1946_s11 = smov (!%p1342_p10), 0  }
 0x3a4   : > { %s1948_s20 = smov (!%p1342_p10), 0  }
 0x3a7 LB: >> { %v1115_v27 = vld [vmem:[%s1570_s17] sm:$0xff]  ;;  %v1117_v28 = vld [vmem:[%s1570_s17 + $0x8] sm:$0xff]  ;;  %v1119_v29 = vld [vmem:[%s1570_s17 + $0x10] sm:$0xff]  ;;  %s1179_s21 = sadd.s32 1, %s1574_s11  ;;  %s1109_s20 = sadd.s32 1, %s1578_s20   ;;  %s1578_s20 = sphi %s1948_s20, %s1109_s20   ;;  %s1574_s11 = sphi %s1946_s11, %s2081_s11   ;;  %s1570_s17 = sphi %s2078_s17, %s2080_s17   ;;  %s1566_s12 = sphi %s2077_s12, %s2079_s12  }
 0x3a8   : >> { %1116 = vst [vmem:[%s1566_s12] sm:$0xff] %v1115_v27  ;;  %v1121_v31 = vld [vmem:[%s1570_s17 + $0x18] sm:$0xff]  ;;  %p1180_p11 = scmp.ge.s32.totalorder %s1179_s21, %s1937_s19  ;;  %v1123_v33 = vld [vmem:[%s1570_s17 + $0x20] sm:$0xff]  ;;  %v1125_v35 = vld [vmem:[%s1570_s17 + $0x28] sm:$0xff]  ;;  %p1108_p12 = scmp.ge.s32.totalorder %s1109_s20, %s1937_s19 }
 0x3a9   : >> { %1118 = vst [vmem:[%s1566_s12 + $0x8] sm:$0xff] %v1117_v28  ;;  %v1127_v36 = vld [vmem:[%s1570_s17 + $0x30] sm:$0xff]  ;;  %v1129_v37 = vld [vmem:[%s1570_s17 + $0x38] sm:$0xff]  ;;  %v1131_v30 = vld [vmem:[%s1570_s17 + $0x40] sm:$0xff] }
 0x3aa   : >> { %1120 = vst [vmem:[%s1566_s12 + $0x10] sm:$0xff] %v1119_v29  ;;  %s2088_s21 = smov (%p1180_p11, %s1179_s21), 0  ;;  %v1133_v38 = vld [vmem:[%s1570_s17 + $0x48] sm:$0xff]  ;;  %v1135_v40 = vld [vmem:[%s1570_s17 + $0x50] sm:$0xff]  ;;  %v1137_v41 = vld [vmem:[%s1570_s17 + $0x58] sm:$0xff] }
 0x3ab   : >> { %1122 = vst [vmem:[%s1566_s12 + $0x18] sm:$0xff] %v1121_v31  ;;  %s1343_s22 = sshll.u32 %s2088_s21, 8  ;;  %v1139_v42 = vld [vmem:[%s1570_s17 + $0x60] sm:$0xff]  ;;  %v1141_v43 = vld [vmem:[%s1570_s17 + $0x68] sm:$0xff]  ;;  %v1143_v44 = vld [vmem:[%s1570_s17 + $0x70] sm:$0xff]  ;;  %s2081_s11 = smov %s2088_s21 }
 0x3ac   : >> { %1124 = vst [vmem:[%s1566_s12 + $0x20] sm:$0xff] %v1123_v33  ;;  %s1980_s23 = scalar_lea.vmem %s1858_s27, %s1343_s22 [#allocation2]   ;;  %s1983_s24 = scalar_lea.vmem %s1931_s15, %s1343_s22   ;;  %v1145_v45 = vld [vmem:[%s1570_s17 + $0x78] sm:$0xff]  ;;  %v1147_v46 = vld [vmem:[%s1570_s17 + $0x80] sm:$0xff]  ;;  %v1149_v34 = vld [vmem:[%s1570_s17 + $0x88] sm:$0xff] }
 0x3ad   : >> { %1126 = vst [vmem:[%s1566_s12 + $0x28] sm:$0xff] %v1125_v35  ;;  %v1151_v47 = vld [vmem:[%s1570_s17 + $0x90] sm:$0xff]  ;;  %v1153_v25 = vld [vmem:[%s1570_s17 + $0x98] sm:$0xff]  ;;  %v1155_v48 = vld [vmem:[%s1570_s17 + $0xa0] sm:$0xff] }
 0x3ae   : >> { %1128 = vst [vmem:[%s1566_s12 + $0x30] sm:$0xff] %v1127_v36  ;;  %v1157_v32 = vld [vmem:[%s1570_s17 + $0xa8] sm:$0xff]  ;;  %v1159_v49 = vld [vmem:[%s1570_s17 + $0xb0] sm:$0xff]  ;;  %v1161_v24 = vld [vmem:[%s1570_s17 + $0xb8] sm:$0xff] }
 0x3af   : >> { %1130 = vst [vmem:[%s1566_s12 + $0x38] sm:$0xff] %v1129_v37  ;;  %v1163_v39 = vld [vmem:[%s1570_s17 + $0xc0] sm:$0xff]  ;;  %v1165_v50 = vld [vmem:[%s1570_s17 + $0xc8] sm:$0xff]  ;;  %v1167_v26 = vld [vmem:[%s1570_s17 + $0xd0] sm:$0xff] }
 0x3b0   : >> { %1132 = vst [vmem:[%s1566_s12 + $0x40] sm:$0xff] %v1131_v30  ;;  %v1169_v51 = vld [vmem:[%s1570_s17 + $0xd8] sm:$0xff]  ;;  %v1171_v2 = vld [vmem:[%s1570_s17 + $0xe0] sm:$0xff]  ;;  %v1173_v53 = vld [vmem:[%s1570_s17 + $0xe8] sm:$0xff] }
 0x3b1   : >> { %1134 = vst [vmem:[%s1566_s12 + $0x48] sm:$0xff] %v1133_v38  ;;  %v1175_v54 = vld [vmem:[%s1570_s17 + $0xf0] sm:$0xff]  ;;  %v1177_v55 = vld [vmem:[%s1570_s17 + $0xf8] sm:$0xff]  ;;  %s2080_s17 = smov %s1980_s23 }
 0x3b2   : >> { %1136 = vst [vmem:[%s1566_s12 + $0x50] sm:$0xff] %v1135_v40 }
 0x3b3   : >> { %1138 = vst [vmem:[%s1566_s12 + $0x58] sm:$0xff] %v1137_v41 }
 0x3b4   : >> { %1140 = vst [vmem:[%s1566_s12 + $0x60] sm:$0xff] %v1139_v42 }
 0x3b5   : >> { %1142 = vst [vmem:[%s1566_s12 + $0x68] sm:$0xff] %v1141_v43 }
 0x3b6   : >> { %1144 = vst [vmem:[%s1566_s12 + $0x70] sm:$0xff] %v1143_v44 }
 0x3b7   : >> { %1146 = vst [vmem:[%s1566_s12 + $0x78] sm:$0xff] %v1145_v45 }
 0x3b8   : >> { %1148 = vst [vmem:[%s1566_s12 + $0x80] sm:$0xff] %v1147_v46 }
 0x3b9   : >> { %1150 = vst [vmem:[%s1566_s12 + $0x88] sm:$0xff] %v1149_v34 }
 0x3ba   : >> { %1152 = vst [vmem:[%s1566_s12 + $0x90] sm:$0xff] %v1151_v47 }
 0x3bb   : >> { %1154 = vst [vmem:[%s1566_s12 + $0x98] sm:$0xff] %v1153_v25 }
 0x3bc   : >> { %1156 = vst [vmem:[%s1566_s12 + $0xa0] sm:$0xff] %v1155_v48 }
 0x3bd   : >> { %1158 = vst [vmem:[%s1566_s12 + $0xa8] sm:$0xff] %v1157_v32 }
 0x3be   : >> { %1160 = vst [vmem:[%s1566_s12 + $0xb0] sm:$0xff] %v1159_v49 }
 0x3bf   : >> { %1162 = vst [vmem:[%s1566_s12 + $0xb8] sm:$0xff] %v1161_v24 }
 0x3c0   : >> { %1164 = vst [vmem:[%s1566_s12 + $0xc0] sm:$0xff] %v1163_v39 }
 0x3c1   : >> { %1166 = vst [vmem:[%s1566_s12 + $0xc8] sm:$0xff] %v1165_v50 }
 0x3c2   : >> { %1168 = vst [vmem:[%s1566_s12 + $0xd0] sm:$0xff] %v1167_v26 }
 0x3c3   : >> { %1170 = vst [vmem:[%s1566_s12 + $0xd8] sm:$0xff] %v1169_v51  ;;  %1111 = sbr.rel (!%p1108_p12) target bundleno = 935 (0x3a7), region = 146 }
 0x3c4   : >> { %1172 = vst [vmem:[%s1566_s12 + $0xe0] sm:$0xff] %v1171_v2 }
 0x3c5   : >> { %1174 = vst [vmem:[%s1566_s12 + $0xe8] sm:$0xff] %v1173_v53 }
 0x3c6   : >> { %1176 = vst [vmem:[%s1566_s12 + $0xf0] sm:$0xff] %v1175_v54 }
 0x3c7   : >> { %1178 = vst [vmem:[%s1566_s12 + $0xf8] sm:$0xff] %v1177_v55  ;;  %s2079_s12 = smov %s1983_s24 }
 0x3c8 PF: > { %s2048_s25 = sand.u32 31, %s2086_s30   ;;  %s1354_s26 = sshll.u32 %s1937_s19, 8 }
 0x3c9   : > { %s1190_s28 = scalar_lea.vmem %s1858_s27, %s1354_s26 [#allocation2]   ;;  %s1192_s29 = scalar_lea.vmem %s1931_s15, %s1354_s26  }
 0x3ca   : > { %p1348_p13 = scmp.le.s32.totalorder %s2048_s25, 0 }
 0x3cb   : > { %s1580_s14 = smov (!%p1348_p13), %s1192_s29   ;;  %s1584_s18 = smov (!%p1348_p13), %s1190_s28  }
 0x3cc   : > { %1283 = sbr.rel (%p1348_p13) target bundleno = 985 (0x3d9), region = 151  ;;  %s1588_s22 = smov (!%p1348_p13), 0  }
 0x3cd   : > { %s1592_s21 = smov (!%p1348_p13), 0  }
 0x3d1 LB: >> { %v1202_v52 = vld [vmem:[%s1586_s18] sm:$0xff]  ;;  %s1204_s30 = sadd.s32 1, %s1590_s22  ;;  %s1196_s21 = sadd.s32 1, %s1594_s21   ;;  %s1594_s21 = sphi %s1592_s21, %s1196_s21   ;;  %s1590_s22 = sphi %s1588_s22, %s1589_s22   ;;  %s1586_s18 = sphi %s1584_s18, %s1209_s18   ;;  %s1582_s14 = sphi %s1580_s14, %s1210_s14  }
 0x3d2   : >> { %1203 = vst [vmem:[%s1582_s14] sm:$0xff] %v1202_v52  ;;  %p1205_p0 = scmp.ge.s32.totalorder %s1204_s30, %s2048_s25  ;;  %p1195_p1 = scmp.ge.s32.totalorder %s1196_s21, %s2048_s25 }
 0x3d4   : >> { %s2090_s30 = smov (%p1205_p0, %s1204_s30), 0  ;;  %1198 = sbr.rel (!%p1195_p1) target bundleno = 977 (0x3d1), region = 157 }
 0x3d5   : >> { %s1349_s27 = sshll.u32 %s2090_s30, 3  ;;  %s1589_s22 = smov %s2090_s30  }
 0x3d6   : >> { %s1209_s18 = scalar_lea.vmem %s1190_s28, %s1349_s27 [#allocation2]   ;;  %s1210_s14 = scalar_lea.vmem %s1192_s29, %s1349_s27  }
 0x3d9 PF: > { %p16_p2 = scmp.ge.s32.totalorder %s1663_s13, 6   ;;  %s2082_s30 = smov %s1558_s10 }
 0x3da   : > { %s2083_s10 = smov %s1671_s16  ;;  %s2084_s11 = smov %s1663_s13 }
 0x3db   :  { %18 = sbr.rel (!%p16_p2) target bundleno = 2 (0x2), region = 168 }

</bundles_post_ra>
